<compile_context>
chip_gen: v5e
topology: v5e:2x2
jax: 0.10.0
libtpu: 0.0.40
codegen_flags: <defaults>
</compile_context>

<pallas_src>
import jax
import jax.numpy as jnp
from jax import lax
from jax.experimental import pallas as pl
from jax.experimental.pallas import tpu as pltpu

HIDDEN = 32
LANES = 128
SUBLANES = 8
CHUNK_ROWS = 64  # 64 rows x 128 lanes f32 = 8 vregs per live value


def _student_mlp_kernel(w1_ref, b1_ref, w2_ref, b2_ref, x_ref, o_ref):
    # x_ref/o_ref: (bm, 128) f32 tile, batch elements mapped to lanes/sublanes.
    # w1/b1/w2: (32,) f32 in SMEM; b2: (1,) f32 in SMEM.
    bm = x_ref.shape[0]
    chunk = min(CHUNK_ROWS, bm)
    n_full = bm // chunk
    rem = bm - n_full * chunk          # bm and chunk are multiples of 8 -> rem is too

    b2 = b2_ref[0]

    def process(row_start, size):
        x = x_ref[pl.ds(row_start, size), :]
        # Dual accumulators keep all 4 VALU slots fed (no single long add chain);
        # b2 is folded into acc0's init.
        acc0 = jnp.maximum(x * w1_ref[0] + b1_ref[0], 0.0) * w2_ref[0] + b2
        acc1 = jnp.maximum(x * w1_ref[1] + b1_ref[1], 0.0) * w2_ref[1]
        for j in range(2, HIDDEN, 2):
            acc0 = acc0 + jnp.maximum(x * w1_ref[j] + b1_ref[j], 0.0) * w2_ref[j]
            acc1 = acc1 + jnp.maximum(x * w1_ref[j + 1] + b1_ref[j + 1], 0.0) * w2_ref[j + 1]
        # Lane-dense store (no masking; last dim is a full 128 lanes).
        o_ref[pl.ds(row_start, size), :] = acc0 + acc1

    if n_full == 1 and rem == 0:
        process(0, chunk)
    else:
        def body(c, carry):
            process(pl.multiple_of(c * chunk, chunk), chunk)
            return carry
        lax.fori_loop(0, n_full, body, 0)
        if rem:
            process(n_full * chunk, rem)   # static tail chunk (multiple of 8 rows)


def student_net_forward(x, w1, b1, w2, b2, *, block_rows=2048):
    """x: (B, 1) f32; w1: (1, 32); b1: (32,); w2: (32, 1); b2: (1,). Returns (B, 1)."""
    B = x.shape[0]

    # --- layout plumbing: batch onto the lane axis ---
    rows = max(1, -(-B // LANES))                       # ceil(B / 128)
    rows8 = max(SUBLANES, -(-rows // SUBLANES) * SUBLANES)  # sublane-aligned rows

    # Block rows: split into >= 2 blocks whenever possible so the "parallel"
    # grid axis shards across both TensorCores on v7x; cap at block_rows so the
    # per-block VMEM working set stays small and the grid amortizes step cost.
    if rows8 > SUBLANES:
        bm = -(-rows8 // 2)
        bm = -(-bm // SUBLANES) * SUBLANES
        bm = min(bm, block_rows)
    else:
        bm = rows8
    n_blocks = -(-rows8 // bm)
    rows_padded = n_blocks * bm
    total = rows_padded * LANES

    x_flat = x.reshape(-1).astype(jnp.float32)
    if total != B:                       # skip the extra HBM pass when aligned
        x_flat = jnp.pad(x_flat, (0, total - B))
    x2d = x_flat.reshape(rows_padded, LANES)

    w1_s = w1.reshape(-1).astype(jnp.float32)   # (32,)
    b1_s = b1.reshape(-1).astype(jnp.float32)   # (32,)
    w2_s = w2.reshape(-1).astype(jnp.float32)   # (32,)
    b2_s = b2.reshape(-1).astype(jnp.float32)   # (1,)

    smem = pl.BlockSpec(memory_space=pltpu.MemorySpace.SMEM)
    tile = pl.BlockSpec((bm, LANES), lambda i: (i, 0))

    out2d = pl.pallas_call(
        _student_mlp_kernel,
        out_shape=jax.ShapeDtypeStruct((rows_padded, LANES), jnp.float32),
        grid=(n_blocks,),
        in_specs=[smem, smem, smem, smem, tile],
        out_specs=tile,
        compiler_params=pltpu.CompilerParams(
            dimension_semantics=("parallel",)),
        cost_estimate=pl.CostEstimate(
            flops=5 * HIDDEN * total,
            transcendentals=0,
            bytes_accessed=8 * total),
    )(w1_s, b1_s, w2_s, b2_s, x2d)

    out_flat = out2d.reshape(-1)
    if total != B:                       # skip the extra HBM pass when aligned
        out_flat = out_flat[:B]
    return out_flat.reshape(B, 1)


def _init_params(key):
    """PyTorch nn.Linear default init: U(-1/sqrt(fan_in), 1/sqrt(fan_in))."""
    k1, k2, k3, k4 = jax.random.split(key, 4)
    bound1 = 1.0 / jnp.sqrt(1.0)
    w1 = jax.random.uniform(k1, (1, HIDDEN), jnp.float32, -bound1, bound1)
    b1 = jax.random.uniform(k2, (HIDDEN,), jnp.float32, -bound1, bound1)
    bound2 = 1.0 / jnp.sqrt(float(HIDDEN))
    w2 = jax.random.uniform(k3, (HIDDEN, 1), jnp.float32, -bound2, bound2)
    b2 = jax.random.uniform(k4, (1,), jnp.float32, -bound2, bound2)
    return w1, b1, w2, b2


def _reference(x, w1, b1, w2, b2):
    # Pure-VPU reference (avoids MXU precision ambiguity for the f32 check).
    h = jnp.maximum(x * w1.reshape(1, -1) + b1.reshape(1, -1), 0.0)        # (B, 32)
    return jnp.sum(h * w2.reshape(1, -1), axis=-1, keepdims=True) + b2.reshape(1, -1)


if __name__ == "__main__":
    key = jax.random.PRNGKey(0)
    k_params, k_x1, k_x2, k_x3 = jax.random.split(key, 4)
    w1, b1, w2, b2 = _init_params(k_params)

    # Small batch (partial lane tile, single block, direct chunk path).
    B = 8
    x = jax.random.normal(k_x1, (B, 1), jnp.float32)
    out = jax.block_until_ready(student_net_forward(x, w1, b1, w2, b2))
    ref = _reference(x, w1, b1, w2, b2)
    assert out.shape == (B, 1)
    assert jnp.allclose(out, ref, atol=1e-5, rtol=1e-5)

    # Ragged batch (lane/sublane padding and the slice-back path).
    B2 = 300
    x2 = jax.random.normal(k_x2, (B2, 1), jnp.float32)
    out2 = jax.block_until_ready(student_net_forward(x2, w1, b1, w2, b2))
    ref2 = _reference(x2, w1, b1, w2, b2)
    assert out2.shape == (B2, 1)
    assert jnp.allclose(out2, ref2, atol=1e-5, rtol=1e-5)

    # Larger ragged batch (multi-block grid, in-kernel chunk loop + tail chunk).
    B3 = 33000
    x3 = jax.random.normal(k_x3, (B3, 1), jnp.float32)
    out3 = jax.block_until_ready(student_net_forward(x3, w1, b1, w2, b2))
    ref3 = _reference(x3, w1, b1, w2, b2)
    assert out3.shape == (B3, 1)
    assert jnp.allclose(out3, ref3, atol=1e-5, rtol=1e-5)

    print("KERNEL_OK")
</pallas_src>

<mosaic_0001>
module attributes {stable_mosaic.version = 11 : i64} {
  func.func @_student_mlp_kernel(%arg0: i32, %arg1: memref<32xf32, #tpu.memory_space<smem>>, %arg2: memref<32xf32, #tpu.memory_space<smem>>, %arg3: memref<32xf32, #tpu.memory_space<smem>>, %arg4: memref<1xf32, #tpu.memory_space<smem>>, %arg5: memref<8x128xf32, #tpu.memory_space<vmem>>, %arg6: memref<8x128xf32, #tpu.memory_space<vmem>>) attributes {dimension_semantics = [#tpu.dimension_semantics<parallel>], iteration_bounds = array<i64: 1>, scalar_prefetch = 0 : i64, scratch_operands = 0 : i64, tpu.core_type = #tpu.core_type<tc>, window_params = [{transform_indices = @transform_0, window_bounds = array<i64: 32>}, {transform_indices = @transform_1, window_bounds = array<i64: 32>}, {transform_indices = @transform_2, window_bounds = array<i64: 32>}, {transform_indices = @transform_3, window_bounds = array<i64: 1>}, {transform_indices = @transform_4, window_bounds = array<i64: 8, 128>}, {transform_indices = @transform_5, window_bounds = array<i64: 8, 128>}]} {
    %c0 = arith.constant 0 : index
    %0 = memref.load %arg4[%c0] : memref<1xf32, #tpu.memory_space<smem>>
    %c0_0 = arith.constant 0 : index
    %c0_1 = arith.constant 0 : index
    %1 = vector.load %arg5[%c0_0, %c0_1] : memref<8x128xf32, #tpu.memory_space<vmem>>, vector<8x128xf32>
    %c0_2 = arith.constant 0 : index
    %2 = memref.load %arg1[%c0_2] : memref<32xf32, #tpu.memory_space<smem>>
    %3 = vector.broadcast %2 : f32 to vector<8x128xf32>
    %4 = arith.mulf %1, %3 : vector<8x128xf32>
    %c0_3 = arith.constant 0 : index
    %5 = memref.load %arg2[%c0_3] : memref<32xf32, #tpu.memory_space<smem>>
    %6 = vector.broadcast %5 : f32 to vector<8x128xf32>
    %7 = arith.addf %4, %6 : vector<8x128xf32>
    %cst = arith.constant 0.000000e+00 : f32
    %8 = vector.broadcast %cst : f32 to vector<8x128xf32>
    %9 = arith.maximumf %7, %8 : vector<8x128xf32>
    %c0_4 = arith.constant 0 : index
    %10 = memref.load %arg3[%c0_4] : memref<32xf32, #tpu.memory_space<smem>>
    %11 = vector.broadcast %10 : f32 to vector<8x128xf32>
    %12 = arith.mulf %9, %11 : vector<8x128xf32>
    %13 = vector.broadcast %0 : f32 to vector<8x128xf32>
    %14 = arith.addf %12, %13 : vector<8x128xf32>
    %c1 = arith.constant 1 : index
    %15 = memref.load %arg1[%c1] : memref<32xf32, #tpu.memory_space<smem>>
    %16 = vector.broadcast %15 : f32 to vector<8x128xf32>
    %17 = arith.mulf %1, %16 : vector<8x128xf32>
    %c1_5 = arith.constant 1 : index
    %18 = memref.load %arg2[%c1_5] : memref<32xf32, #tpu.memory_space<smem>>
    %19 = vector.broadcast %18 : f32 to vector<8x128xf32>
    %20 = arith.addf %17, %19 : vector<8x128xf32>
    %cst_6 = arith.constant 0.000000e+00 : f32
    %21 = vector.broadcast %cst_6 : f32 to vector<8x128xf32>
    %22 = arith.maximumf %20, %21 : vector<8x128xf32>
    %c1_7 = arith.constant 1 : index
    %23 = memref.load %arg3[%c1_7] : memref<32xf32, #tpu.memory_space<smem>>
    %24 = vector.broadcast %23 : f32 to vector<8x128xf32>
    %25 = arith.mulf %22, %24 : vector<8x128xf32>
    %c2 = arith.constant 2 : index
    %26 = memref.load %arg1[%c2] : memref<32xf32, #tpu.memory_space<smem>>
    %27 = vector.broadcast %26 : f32 to vector<8x128xf32>
    %28 = arith.mulf %1, %27 : vector<8x128xf32>
    %c2_8 = arith.constant 2 : index
    %29 = memref.load %arg2[%c2_8] : memref<32xf32, #tpu.memory_space<smem>>
    %30 = vector.broadcast %29 : f32 to vector<8x128xf32>
    %31 = arith.addf %28, %30 : vector<8x128xf32>
    %cst_9 = arith.constant 0.000000e+00 : f32
    %32 = vector.broadcast %cst_9 : f32 to vector<8x128xf32>
    %33 = arith.maximumf %31, %32 : vector<8x128xf32>
    %c2_10 = arith.constant 2 : index
    %34 = memref.load %arg3[%c2_10] : memref<32xf32, #tpu.memory_space<smem>>
    %35 = vector.broadcast %34 : f32 to vector<8x128xf32>
    %36 = arith.mulf %33, %35 : vector<8x128xf32>
    %37 = arith.addf %14, %36 : vector<8x128xf32>
    %c3 = arith.constant 3 : index
    %38 = memref.load %arg1[%c3] : memref<32xf32, #tpu.memory_space<smem>>
    %39 = vector.broadcast %38 : f32 to vector<8x128xf32>
    %40 = arith.mulf %1, %39 : vector<8x128xf32>
    %c3_11 = arith.constant 3 : index
    %41 = memref.load %arg2[%c3_11] : memref<32xf32, #tpu.memory_space<smem>>
    %42 = vector.broadcast %41 : f32 to vector<8x128xf32>
    %43 = arith.addf %40, %42 : vector<8x128xf32>
    %cst_12 = arith.constant 0.000000e+00 : f32
    %44 = vector.broadcast %cst_12 : f32 to vector<8x128xf32>
    %45 = arith.maximumf %43, %44 : vector<8x128xf32>
    %c3_13 = arith.constant 3 : index
    %46 = memref.load %arg3[%c3_13] : memref<32xf32, #tpu.memory_space<smem>>
    %47 = vector.broadcast %46 : f32 to vector<8x128xf32>
    %48 = arith.mulf %45, %47 : vector<8x128xf32>
    %49 = arith.addf %25, %48 : vector<8x128xf32>
    %c4 = arith.constant 4 : index
    %50 = memref.load %arg1[%c4] : memref<32xf32, #tpu.memory_space<smem>>
    %51 = vector.broadcast %50 : f32 to vector<8x128xf32>
    %52 = arith.mulf %1, %51 : vector<8x128xf32>
    %c4_14 = arith.constant 4 : index
    %53 = memref.load %arg2[%c4_14] : memref<32xf32, #tpu.memory_space<smem>>
    %54 = vector.broadcast %53 : f32 to vector<8x128xf32>
    %55 = arith.addf %52, %54 : vector<8x128xf32>
    %cst_15 = arith.constant 0.000000e+00 : f32
    %56 = vector.broadcast %cst_15 : f32 to vector<8x128xf32>
    %57 = arith.maximumf %55, %56 : vector<8x128xf32>
    %c4_16 = arith.constant 4 : index
    %58 = memref.load %arg3[%c4_16] : memref<32xf32, #tpu.memory_space<smem>>
    %59 = vector.broadcast %58 : f32 to vector<8x128xf32>
    %60 = arith.mulf %57, %59 : vector<8x128xf32>
    %61 = arith.addf %37, %60 : vector<8x128xf32>
    %c5 = arith.constant 5 : index
    %62 = memref.load %arg1[%c5] : memref<32xf32, #tpu.memory_space<smem>>
    %63 = vector.broadcast %62 : f32 to vector<8x128xf32>
    %64 = arith.mulf %1, %63 : vector<8x128xf32>
    %c5_17 = arith.constant 5 : index
    %65 = memref.load %arg2[%c5_17] : memref<32xf32, #tpu.memory_space<smem>>
    %66 = vector.broadcast %65 : f32 to vector<8x128xf32>
    %67 = arith.addf %64, %66 : vector<8x128xf32>
    %cst_18 = arith.constant 0.000000e+00 : f32
    %68 = vector.broadcast %cst_18 : f32 to vector<8x128xf32>
    %69 = arith.maximumf %67, %68 : vector<8x128xf32>
    %c5_19 = arith.constant 5 : index
    %70 = memref.load %arg3[%c5_19] : memref<32xf32, #tpu.memory_space<smem>>
    %71 = vector.broadcast %70 : f32 to vector<8x128xf32>
    %72 = arith.mulf %69, %71 : vector<8x128xf32>
    %73 = arith.addf %49, %72 : vector<8x128xf32>
    %c6 = arith.constant 6 : index
    %74 = memref.load %arg1[%c6] : memref<32xf32, #tpu.memory_space<smem>>
    %75 = vector.broadcast %74 : f32 to vector<8x128xf32>
    %76 = arith.mulf %1, %75 : vector<8x128xf32>
    %c6_20 = arith.constant 6 : index
    %77 = memref.load %arg2[%c6_20] : memref<32xf32, #tpu.memory_space<smem>>
    %78 = vector.broadcast %77 : f32 to vector<8x128xf32>
    %79 = arith.addf %76, %78 : vector<8x128xf32>
    %cst_21 = arith.constant 0.000000e+00 : f32
    %80 = vector.broadcast %cst_21 : f32 to vector<8x128xf32>
    %81 = arith.maximumf %79, %80 : vector<8x128xf32>
    %c6_22 = arith.constant 6 : index
    %82 = memref.load %arg3[%c6_22] : memref<32xf32, #tpu.memory_space<smem>>
    %83 = vector.broadcast %82 : f32 to vector<8x128xf32>
    %84 = arith.mulf %81, %83 : vector<8x128xf32>
    %85 = arith.addf %61, %84 : vector<8x128xf32>
    %c7 = arith.constant 7 : index
    %86 = memref.load %arg1[%c7] : memref<32xf32, #tpu.memory_space<smem>>
    %87 = vector.broadcast %86 : f32 to vector<8x128xf32>
    %88 = arith.mulf %1, %87 : vector<8x128xf32>
    %c7_23 = arith.constant 7 : index
    %89 = memref.load %arg2[%c7_23] : memref<32xf32, #tpu.memory_space<smem>>
    %90 = vector.broadcast %89 : f32 to vector<8x128xf32>
    %91 = arith.addf %88, %90 : vector<8x128xf32>
    %cst_24 = arith.constant 0.000000e+00 : f32
    %92 = vector.broadcast %cst_24 : f32 to vector<8x128xf32>
    %93 = arith.maximumf %91, %92 : vector<8x128xf32>
    %c7_25 = arith.constant 7 : index
    %94 = memref.load %arg3[%c7_25] : memref<32xf32, #tpu.memory_space<smem>>
    %95 = vector.broadcast %94 : f32 to vector<8x128xf32>
    %96 = arith.mulf %93, %95 : vector<8x128xf32>
    %97 = arith.addf %73, %96 : vector<8x128xf32>
    %c8 = arith.constant 8 : index
    %98 = memref.load %arg1[%c8] : memref<32xf32, #tpu.memory_space<smem>>
    %99 = vector.broadcast %98 : f32 to vector<8x128xf32>
    %100 = arith.mulf %1, %99 : vector<8x128xf32>
    %c8_26 = arith.constant 8 : index
    %101 = memref.load %arg2[%c8_26] : memref<32xf32, #tpu.memory_space<smem>>
    %102 = vector.broadcast %101 : f32 to vector<8x128xf32>
    %103 = arith.addf %100, %102 : vector<8x128xf32>
    %cst_27 = arith.constant 0.000000e+00 : f32
    %104 = vector.broadcast %cst_27 : f32 to vector<8x128xf32>
    %105 = arith.maximumf %103, %104 : vector<8x128xf32>
    %c8_28 = arith.constant 8 : index
    %106 = memref.load %arg3[%c8_28] : memref<32xf32, #tpu.memory_space<smem>>
    %107 = vector.broadcast %106 : f32 to vector<8x128xf32>
    %108 = arith.mulf %105, %107 : vector<8x128xf32>
    %109 = arith.addf %85, %108 : vector<8x128xf32>
    %c9 = arith.constant 9 : index
    %110 = memref.load %arg1[%c9] : memref<32xf32, #tpu.memory_space<smem>>
    %111 = vector.broadcast %110 : f32 to vector<8x128xf32>
    %112 = arith.mulf %1, %111 : vector<8x128xf32>
    %c9_29 = arith.constant 9 : index
    %113 = memref.load %arg2[%c9_29] : memref<32xf32, #tpu.memory_space<smem>>
    %114 = vector.broadcast %113 : f32 to vector<8x128xf32>
    %115 = arith.addf %112, %114 : vector<8x128xf32>
    %cst_30 = arith.constant 0.000000e+00 : f32
    %116 = vector.broadcast %cst_30 : f32 to vector<8x128xf32>
    %117 = arith.maximumf %115, %116 : vector<8x128xf32>
    %c9_31 = arith.constant 9 : index
    %118 = memref.load %arg3[%c9_31] : memref<32xf32, #tpu.memory_space<smem>>
    %119 = vector.broadcast %118 : f32 to vector<8x128xf32>
    %120 = arith.mulf %117, %119 : vector<8x128xf32>
    %121 = arith.addf %97, %120 : vector<8x128xf32>
    %c10 = arith.constant 10 : index
    %122 = memref.load %arg1[%c10] : memref<32xf32, #tpu.memory_space<smem>>
    %123 = vector.broadcast %122 : f32 to vector<8x128xf32>
    %124 = arith.mulf %1, %123 : vector<8x128xf32>
    %c10_32 = arith.constant 10 : index
    %125 = memref.load %arg2[%c10_32] : memref<32xf32, #tpu.memory_space<smem>>
    %126 = vector.broadcast %125 : f32 to vector<8x128xf32>
    %127 = arith.addf %124, %126 : vector<8x128xf32>
    %cst_33 = arith.constant 0.000000e+00 : f32
    %128 = vector.broadcast %cst_33 : f32 to vector<8x128xf32>
    %129 = arith.maximumf %127, %128 : vector<8x128xf32>
    %c10_34 = arith.constant 10 : index
    %130 = memref.load %arg3[%c10_34] : memref<32xf32, #tpu.memory_space<smem>>
    %131 = vector.broadcast %130 : f32 to vector<8x128xf32>
    %132 = arith.mulf %129, %131 : vector<8x128xf32>
    %133 = arith.addf %109, %132 : vector<8x128xf32>
    %c11 = arith.constant 11 : index
    %134 = memref.load %arg1[%c11] : memref<32xf32, #tpu.memory_space<smem>>
    %135 = vector.broadcast %134 : f32 to vector<8x128xf32>
    %136 = arith.mulf %1, %135 : vector<8x128xf32>
    %c11_35 = arith.constant 11 : index
    %137 = memref.load %arg2[%c11_35] : memref<32xf32, #tpu.memory_space<smem>>
    %138 = vector.broadcast %137 : f32 to vector<8x128xf32>
    %139 = arith.addf %136, %138 : vector<8x128xf32>
    %cst_36 = arith.constant 0.000000e+00 : f32
    %140 = vector.broadcast %cst_36 : f32 to vector<8x128xf32>
    %141 = arith.maximumf %139, %140 : vector<8x128xf32>
    %c11_37 = arith.constant 11 : index
    %142 = memref.load %arg3[%c11_37] : memref<32xf32, #tpu.memory_space<smem>>
    %143 = vector.broadcast %142 : f32 to vector<8x128xf32>
    %144 = arith.mulf %141, %143 : vector<8x128xf32>
    %145 = arith.addf %121, %144 : vector<8x128xf32>
    %c12 = arith.constant 12 : index
    %146 = memref.load %arg1[%c12] : memref<32xf32, #tpu.memory_space<smem>>
    %147 = vector.broadcast %146 : f32 to vector<8x128xf32>
    %148 = arith.mulf %1, %147 : vector<8x128xf32>
    %c12_38 = arith.constant 12 : index
    %149 = memref.load %arg2[%c12_38] : memref<32xf32, #tpu.memory_space<smem>>
    %150 = vector.broadcast %149 : f32 to vector<8x128xf32>
    %151 = arith.addf %148, %150 : vector<8x128xf32>
    %cst_39 = arith.constant 0.000000e+00 : f32
    %152 = vector.broadcast %cst_39 : f32 to vector<8x128xf32>
    %153 = arith.maximumf %151, %152 : vector<8x128xf32>
    %c12_40 = arith.constant 12 : index
    %154 = memref.load %arg3[%c12_40] : memref<32xf32, #tpu.memory_space<smem>>
    %155 = vector.broadcast %154 : f32 to vector<8x128xf32>
    %156 = arith.mulf %153, %155 : vector<8x128xf32>
    %157 = arith.addf %133, %156 : vector<8x128xf32>
    %c13 = arith.constant 13 : index
    %158 = memref.load %arg1[%c13] : memref<32xf32, #tpu.memory_space<smem>>
    %159 = vector.broadcast %158 : f32 to vector<8x128xf32>
    %160 = arith.mulf %1, %159 : vector<8x128xf32>
    %c13_41 = arith.constant 13 : index
    %161 = memref.load %arg2[%c13_41] : memref<32xf32, #tpu.memory_space<smem>>
    %162 = vector.broadcast %161 : f32 to vector<8x128xf32>
    %163 = arith.addf %160, %162 : vector<8x128xf32>
    %cst_42 = arith.constant 0.000000e+00 : f32
    %164 = vector.broadcast %cst_42 : f32 to vector<8x128xf32>
    %165 = arith.maximumf %163, %164 : vector<8x128xf32>
    %c13_43 = arith.constant 13 : index
    %166 = memref.load %arg3[%c13_43] : memref<32xf32, #tpu.memory_space<smem>>
    %167 = vector.broadcast %166 : f32 to vector<8x128xf32>
    %168 = arith.mulf %165, %167 : vector<8x128xf32>
    %169 = arith.addf %145, %168 : vector<8x128xf32>
    %c14 = arith.constant 14 : index
    %170 = memref.load %arg1[%c14] : memref<32xf32, #tpu.memory_space<smem>>
    %171 = vector.broadcast %170 : f32 to vector<8x128xf32>
    %172 = arith.mulf %1, %171 : vector<8x128xf32>
    %c14_44 = arith.constant 14 : index
    %173 = memref.load %arg2[%c14_44] : memref<32xf32, #tpu.memory_space<smem>>
    %174 = vector.broadcast %173 : f32 to vector<8x128xf32>
    %175 = arith.addf %172, %174 : vector<8x128xf32>
    %cst_45 = arith.constant 0.000000e+00 : f32
    %176 = vector.broadcast %cst_45 : f32 to vector<8x128xf32>
    %177 = arith.maximumf %175, %176 : vector<8x128xf32>
    %c14_46 = arith.constant 14 : index
    %178 = memref.load %arg3[%c14_46] : memref<32xf32, #tpu.memory_space<smem>>
    %179 = vector.broadcast %178 : f32 to vector<8x128xf32>
    %180 = arith.mulf %177, %179 : vector<8x128xf32>
    %181 = arith.addf %157, %180 : vector<8x128xf32>
    %c15 = arith.constant 15 : index
    %182 = memref.load %arg1[%c15] : memref<32xf32, #tpu.memory_space<smem>>
    %183 = vector.broadcast %182 : f32 to vector<8x128xf32>
    %184 = arith.mulf %1, %183 : vector<8x128xf32>
    %c15_47 = arith.constant 15 : index
    %185 = memref.load %arg2[%c15_47] : memref<32xf32, #tpu.memory_space<smem>>
    %186 = vector.broadcast %185 : f32 to vector<8x128xf32>
    %187 = arith.addf %184, %186 : vector<8x128xf32>
    %cst_48 = arith.constant 0.000000e+00 : f32
    %188 = vector.broadcast %cst_48 : f32 to vector<8x128xf32>
    %189 = arith.maximumf %187, %188 : vector<8x128xf32>
    %c15_49 = arith.constant 15 : index
    %190 = memref.load %arg3[%c15_49] : memref<32xf32, #tpu.memory_space<smem>>
    %191 = vector.broadcast %190 : f32 to vector<8x128xf32>
    %192 = arith.mulf %189, %191 : vector<8x128xf32>
    %193 = arith.addf %169, %192 : vector<8x128xf32>
    %c16 = arith.constant 16 : index
    %194 = memref.load %arg1[%c16] : memref<32xf32, #tpu.memory_space<smem>>
    %195 = vector.broadcast %194 : f32 to vector<8x128xf32>
    %196 = arith.mulf %1, %195 : vector<8x128xf32>
    %c16_50 = arith.constant 16 : index
    %197 = memref.load %arg2[%c16_50] : memref<32xf32, #tpu.memory_space<smem>>
    %198 = vector.broadcast %197 : f32 to vector<8x128xf32>
    %199 = arith.addf %196, %198 : vector<8x128xf32>
    %cst_51 = arith.constant 0.000000e+00 : f32
    %200 = vector.broadcast %cst_51 : f32 to vector<8x128xf32>
    %201 = arith.maximumf %199, %200 : vector<8x128xf32>
    %c16_52 = arith.constant 16 : index
    %202 = memref.load %arg3[%c16_52] : memref<32xf32, #tpu.memory_space<smem>>
    %203 = vector.broadcast %202 : f32 to vector<8x128xf32>
    %204 = arith.mulf %201, %203 : vector<8x128xf32>
    %205 = arith.addf %181, %204 : vector<8x128xf32>
    %c17 = arith.constant 17 : index
    %206 = memref.load %arg1[%c17] : memref<32xf32, #tpu.memory_space<smem>>
    %207 = vector.broadcast %206 : f32 to vector<8x128xf32>
    %208 = arith.mulf %1, %207 : vector<8x128xf32>
    %c17_53 = arith.constant 17 : index
    %209 = memref.load %arg2[%c17_53] : memref<32xf32, #tpu.memory_space<smem>>
    %210 = vector.broadcast %209 : f32 to vector<8x128xf32>
    %211 = arith.addf %208, %210 : vector<8x128xf32>
    %cst_54 = arith.constant 0.000000e+00 : f32
    %212 = vector.broadcast %cst_54 : f32 to vector<8x128xf32>
    %213 = arith.maximumf %211, %212 : vector<8x128xf32>
    %c17_55 = arith.constant 17 : index
    %214 = memref.load %arg3[%c17_55] : memref<32xf32, #tpu.memory_space<smem>>
    %215 = vector.broadcast %214 : f32 to vector<8x128xf32>
    %216 = arith.mulf %213, %215 : vector<8x128xf32>
    %217 = arith.addf %193, %216 : vector<8x128xf32>
    %c18 = arith.constant 18 : index
    %218 = memref.load %arg1[%c18] : memref<32xf32, #tpu.memory_space<smem>>
    %219 = vector.broadcast %218 : f32 to vector<8x128xf32>
    %220 = arith.mulf %1, %219 : vector<8x128xf32>
    %c18_56 = arith.constant 18 : index
    %221 = memref.load %arg2[%c18_56] : memref<32xf32, #tpu.memory_space<smem>>
    %222 = vector.broadcast %221 : f32 to vector<8x128xf32>
    %223 = arith.addf %220, %222 : vector<8x128xf32>
    %cst_57 = arith.constant 0.000000e+00 : f32
    %224 = vector.broadcast %cst_57 : f32 to vector<8x128xf32>
    %225 = arith.maximumf %223, %224 : vector<8x128xf32>
    %c18_58 = arith.constant 18 : index
    %226 = memref.load %arg3[%c18_58] : memref<32xf32, #tpu.memory_space<smem>>
    %227 = vector.broadcast %226 : f32 to vector<8x128xf32>
    %228 = arith.mulf %225, %227 : vector<8x128xf32>
    %229 = arith.addf %205, %228 : vector<8x128xf32>
    %c19 = arith.constant 19 : index
    %230 = memref.load %arg1[%c19] : memref<32xf32, #tpu.memory_space<smem>>
    %231 = vector.broadcast %230 : f32 to vector<8x128xf32>
    %232 = arith.mulf %1, %231 : vector<8x128xf32>
    %c19_59 = arith.constant 19 : index
    %233 = memref.load %arg2[%c19_59] : memref<32xf32, #tpu.memory_space<smem>>
    %234 = vector.broadcast %233 : f32 to vector<8x128xf32>
    %235 = arith.addf %232, %234 : vector<8x128xf32>
    %cst_60 = arith.constant 0.000000e+00 : f32
    %236 = vector.broadcast %cst_60 : f32 to vector<8x128xf32>
    %237 = arith.maximumf %235, %236 : vector<8x128xf32>
    %c19_61 = arith.constant 19 : index
    %238 = memref.load %arg3[%c19_61] : memref<32xf32, #tpu.memory_space<smem>>
    %239 = vector.broadcast %238 : f32 to vector<8x128xf32>
    %240 = arith.mulf %237, %239 : vector<8x128xf32>
    %241 = arith.addf %217, %240 : vector<8x128xf32>
    %c20 = arith.constant 20 : index
    %242 = memref.load %arg1[%c20] : memref<32xf32, #tpu.memory_space<smem>>
    %243 = vector.broadcast %242 : f32 to vector<8x128xf32>
    %244 = arith.mulf %1, %243 : vector<8x128xf32>
    %c20_62 = arith.constant 20 : index
    %245 = memref.load %arg2[%c20_62] : memref<32xf32, #tpu.memory_space<smem>>
    %246 = vector.broadcast %245 : f32 to vector<8x128xf32>
    %247 = arith.addf %244, %246 : vector<8x128xf32>
    %cst_63 = arith.constant 0.000000e+00 : f32
    %248 = vector.broadcast %cst_63 : f32 to vector<8x128xf32>
    %249 = arith.maximumf %247, %248 : vector<8x128xf32>
    %c20_64 = arith.constant 20 : index
    %250 = memref.load %arg3[%c20_64] : memref<32xf32, #tpu.memory_space<smem>>
    %251 = vector.broadcast %250 : f32 to vector<8x128xf32>
    %252 = arith.mulf %249, %251 : vector<8x128xf32>
    %253 = arith.addf %229, %252 : vector<8x128xf32>
    %c21 = arith.constant 21 : index
    %254 = memref.load %arg1[%c21] : memref<32xf32, #tpu.memory_space<smem>>
    %255 = vector.broadcast %254 : f32 to vector<8x128xf32>
    %256 = arith.mulf %1, %255 : vector<8x128xf32>
    %c21_65 = arith.constant 21 : index
    %257 = memref.load %arg2[%c21_65] : memref<32xf32, #tpu.memory_space<smem>>
    %258 = vector.broadcast %257 : f32 to vector<8x128xf32>
    %259 = arith.addf %256, %258 : vector<8x128xf32>
    %cst_66 = arith.constant 0.000000e+00 : f32
    %260 = vector.broadcast %cst_66 : f32 to vector<8x128xf32>
    %261 = arith.maximumf %259, %260 : vector<8x128xf32>
    %c21_67 = arith.constant 21 : index
    %262 = memref.load %arg3[%c21_67] : memref<32xf32, #tpu.memory_space<smem>>
    %263 = vector.broadcast %262 : f32 to vector<8x128xf32>
    %264 = arith.mulf %261, %263 : vector<8x128xf32>
    %265 = arith.addf %241, %264 : vector<8x128xf32>
    %c22 = arith.constant 22 : index
    %266 = memref.load %arg1[%c22] : memref<32xf32, #tpu.memory_space<smem>>
    %267 = vector.broadcast %266 : f32 to vector<8x128xf32>
    %268 = arith.mulf %1, %267 : vector<8x128xf32>
    %c22_68 = arith.constant 22 : index
    %269 = memref.load %arg2[%c22_68] : memref<32xf32, #tpu.memory_space<smem>>
    %270 = vector.broadcast %269 : f32 to vector<8x128xf32>
    %271 = arith.addf %268, %270 : vector<8x128xf32>
    %cst_69 = arith.constant 0.000000e+00 : f32
    %272 = vector.broadcast %cst_69 : f32 to vector<8x128xf32>
    %273 = arith.maximumf %271, %272 : vector<8x128xf32>
    %c22_70 = arith.constant 22 : index
    %274 = memref.load %arg3[%c22_70] : memref<32xf32, #tpu.memory_space<smem>>
    %275 = vector.broadcast %274 : f32 to vector<8x128xf32>
    %276 = arith.mulf %273, %275 : vector<8x128xf32>
    %277 = arith.addf %253, %276 : vector<8x128xf32>
    %c23 = arith.constant 23 : index
    %278 = memref.load %arg1[%c23] : memref<32xf32, #tpu.memory_space<smem>>
    %279 = vector.broadcast %278 : f32 to vector<8x128xf32>
    %280 = arith.mulf %1, %279 : vector<8x128xf32>
    %c23_71 = arith.constant 23 : index
    %281 = memref.load %arg2[%c23_71] : memref<32xf32, #tpu.memory_space<smem>>
    %282 = vector.broadcast %281 : f32 to vector<8x128xf32>
    %283 = arith.addf %280, %282 : vector<8x128xf32>
    %cst_72 = arith.constant 0.000000e+00 : f32
    %284 = vector.broadcast %cst_72 : f32 to vector<8x128xf32>
    %285 = arith.maximumf %283, %284 : vector<8x128xf32>
    %c23_73 = arith.constant 23 : index
    %286 = memref.load %arg3[%c23_73] : memref<32xf32, #tpu.memory_space<smem>>
    %287 = vector.broadcast %286 : f32 to vector<8x128xf32>
    %288 = arith.mulf %285, %287 : vector<8x128xf32>
    %289 = arith.addf %265, %288 : vector<8x128xf32>
    %c24 = arith.constant 24 : index
    %290 = memref.load %arg1[%c24] : memref<32xf32, #tpu.memory_space<smem>>
    %291 = vector.broadcast %290 : f32 to vector<8x128xf32>
    %292 = arith.mulf %1, %291 : vector<8x128xf32>
    %c24_74 = arith.constant 24 : index
    %293 = memref.load %arg2[%c24_74] : memref<32xf32, #tpu.memory_space<smem>>
    %294 = vector.broadcast %293 : f32 to vector<8x128xf32>
    %295 = arith.addf %292, %294 : vector<8x128xf32>
    %cst_75 = arith.constant 0.000000e+00 : f32
    %296 = vector.broadcast %cst_75 : f32 to vector<8x128xf32>
    %297 = arith.maximumf %295, %296 : vector<8x128xf32>
    %c24_76 = arith.constant 24 : index
    %298 = memref.load %arg3[%c24_76] : memref<32xf32, #tpu.memory_space<smem>>
    %299 = vector.broadcast %298 : f32 to vector<8x128xf32>
    %300 = arith.mulf %297, %299 : vector<8x128xf32>
    %301 = arith.addf %277, %300 : vector<8x128xf32>
    %c25 = arith.constant 25 : index
    %302 = memref.load %arg1[%c25] : memref<32xf32, #tpu.memory_space<smem>>
    %303 = vector.broadcast %302 : f32 to vector<8x128xf32>
    %304 = arith.mulf %1, %303 : vector<8x128xf32>
    %c25_77 = arith.constant 25 : index
    %305 = memref.load %arg2[%c25_77] : memref<32xf32, #tpu.memory_space<smem>>
    %306 = vector.broadcast %305 : f32 to vector<8x128xf32>
    %307 = arith.addf %304, %306 : vector<8x128xf32>
    %cst_78 = arith.constant 0.000000e+00 : f32
    %308 = vector.broadcast %cst_78 : f32 to vector<8x128xf32>
    %309 = arith.maximumf %307, %308 : vector<8x128xf32>
    %c25_79 = arith.constant 25 : index
    %310 = memref.load %arg3[%c25_79] : memref<32xf32, #tpu.memory_space<smem>>
    %311 = vector.broadcast %310 : f32 to vector<8x128xf32>
    %312 = arith.mulf %309, %311 : vector<8x128xf32>
    %313 = arith.addf %289, %312 : vector<8x128xf32>
    %c26 = arith.constant 26 : index
    %314 = memref.load %arg1[%c26] : memref<32xf32, #tpu.memory_space<smem>>
    %315 = vector.broadcast %314 : f32 to vector<8x128xf32>
    %316 = arith.mulf %1, %315 : vector<8x128xf32>
    %c26_80 = arith.constant 26 : index
    %317 = memref.load %arg2[%c26_80] : memref<32xf32, #tpu.memory_space<smem>>
    %318 = vector.broadcast %317 : f32 to vector<8x128xf32>
    %319 = arith.addf %316, %318 : vector<8x128xf32>
    %cst_81 = arith.constant 0.000000e+00 : f32
    %320 = vector.broadcast %cst_81 : f32 to vector<8x128xf32>
    %321 = arith.maximumf %319, %320 : vector<8x128xf32>
    %c26_82 = arith.constant 26 : index
    %322 = memref.load %arg3[%c26_82] : memref<32xf32, #tpu.memory_space<smem>>
    %323 = vector.broadcast %322 : f32 to vector<8x128xf32>
    %324 = arith.mulf %321, %323 : vector<8x128xf32>
    %325 = arith.addf %301, %324 : vector<8x128xf32>
    %c27 = arith.constant 27 : index
    %326 = memref.load %arg1[%c27] : memref<32xf32, #tpu.memory_space<smem>>
    %327 = vector.broadcast %326 : f32 to vector<8x128xf32>
    %328 = arith.mulf %1, %327 : vector<8x128xf32>
    %c27_83 = arith.constant 27 : index
    %329 = memref.load %arg2[%c27_83] : memref<32xf32, #tpu.memory_space<smem>>
    %330 = vector.broadcast %329 : f32 to vector<8x128xf32>
    %331 = arith.addf %328, %330 : vector<8x128xf32>
    %cst_84 = arith.constant 0.000000e+00 : f32
    %332 = vector.broadcast %cst_84 : f32 to vector<8x128xf32>
    %333 = arith.maximumf %331, %332 : vector<8x128xf32>
    %c27_85 = arith.constant 27 : index
    %334 = memref.load %arg3[%c27_85] : memref<32xf32, #tpu.memory_space<smem>>
    %335 = vector.broadcast %334 : f32 to vector<8x128xf32>
    %336 = arith.mulf %333, %335 : vector<8x128xf32>
    %337 = arith.addf %313, %336 : vector<8x128xf32>
    %c28 = arith.constant 28 : index
    %338 = memref.load %arg1[%c28] : memref<32xf32, #tpu.memory_space<smem>>
    %339 = vector.broadcast %338 : f32 to vector<8x128xf32>
    %340 = arith.mulf %1, %339 : vector<8x128xf32>
    %c28_86 = arith.constant 28 : index
    %341 = memref.load %arg2[%c28_86] : memref<32xf32, #tpu.memory_space<smem>>
    %342 = vector.broadcast %341 : f32 to vector<8x128xf32>
    %343 = arith.addf %340, %342 : vector<8x128xf32>
    %cst_87 = arith.constant 0.000000e+00 : f32
    %344 = vector.broadcast %cst_87 : f32 to vector<8x128xf32>
    %345 = arith.maximumf %343, %344 : vector<8x128xf32>
    %c28_88 = arith.constant 28 : index
    %346 = memref.load %arg3[%c28_88] : memref<32xf32, #tpu.memory_space<smem>>
    %347 = vector.broadcast %346 : f32 to vector<8x128xf32>
    %348 = arith.mulf %345, %347 : vector<8x128xf32>
    %349 = arith.addf %325, %348 : vector<8x128xf32>
    %c29 = arith.constant 29 : index
    %350 = memref.load %arg1[%c29] : memref<32xf32, #tpu.memory_space<smem>>
    %351 = vector.broadcast %350 : f32 to vector<8x128xf32>
    %352 = arith.mulf %1, %351 : vector<8x128xf32>
    %c29_89 = arith.constant 29 : index
    %353 = memref.load %arg2[%c29_89] : memref<32xf32, #tpu.memory_space<smem>>
    %354 = vector.broadcast %353 : f32 to vector<8x128xf32>
    %355 = arith.addf %352, %354 : vector<8x128xf32>
    %cst_90 = arith.constant 0.000000e+00 : f32
    %356 = vector.broadcast %cst_90 : f32 to vector<8x128xf32>
    %357 = arith.maximumf %355, %356 : vector<8x128xf32>
    %c29_91 = arith.constant 29 : index
    %358 = memref.load %arg3[%c29_91] : memref<32xf32, #tpu.memory_space<smem>>
    %359 = vector.broadcast %358 : f32 to vector<8x128xf32>
    %360 = arith.mulf %357, %359 : vector<8x128xf32>
    %361 = arith.addf %337, %360 : vector<8x128xf32>
    %c30 = arith.constant 30 : index
    %362 = memref.load %arg1[%c30] : memref<32xf32, #tpu.memory_space<smem>>
    %363 = vector.broadcast %362 : f32 to vector<8x128xf32>
    %364 = arith.mulf %1, %363 : vector<8x128xf32>
    %c30_92 = arith.constant 30 : index
    %365 = memref.load %arg2[%c30_92] : memref<32xf32, #tpu.memory_space<smem>>
    %366 = vector.broadcast %365 : f32 to vector<8x128xf32>
    %367 = arith.addf %364, %366 : vector<8x128xf32>
    %cst_93 = arith.constant 0.000000e+00 : f32
    %368 = vector.broadcast %cst_93 : f32 to vector<8x128xf32>
    %369 = arith.maximumf %367, %368 : vector<8x128xf32>
    %c30_94 = arith.constant 30 : index
    %370 = memref.load %arg3[%c30_94] : memref<32xf32, #tpu.memory_space<smem>>
    %371 = vector.broadcast %370 : f32 to vector<8x128xf32>
    %372 = arith.mulf %369, %371 : vector<8x128xf32>
    %373 = arith.addf %349, %372 : vector<8x128xf32>
    %c31 = arith.constant 31 : index
    %374 = memref.load %arg1[%c31] : memref<32xf32, #tpu.memory_space<smem>>
    %375 = vector.broadcast %374 : f32 to vector<8x128xf32>
    %376 = arith.mulf %1, %375 : vector<8x128xf32>
    %c31_95 = arith.constant 31 : index
    %377 = memref.load %arg2[%c31_95] : memref<32xf32, #tpu.memory_space<smem>>
    %378 = vector.broadcast %377 : f32 to vector<8x128xf32>
    %379 = arith.addf %376, %378 : vector<8x128xf32>
    %cst_96 = arith.constant 0.000000e+00 : f32
    %380 = vector.broadcast %cst_96 : f32 to vector<8x128xf32>
    %381 = arith.maximumf %379, %380 : vector<8x128xf32>
    %c31_97 = arith.constant 31 : index
    %382 = memref.load %arg3[%c31_97] : memref<32xf32, #tpu.memory_space<smem>>
    %383 = vector.broadcast %382 : f32 to vector<8x128xf32>
    %384 = arith.mulf %381, %383 : vector<8x128xf32>
    %385 = arith.addf %361, %384 : vector<8x128xf32>
    %386 = arith.addf %373, %385 : vector<8x128xf32>
    %c0_98 = arith.constant 0 : index
    %c0_99 = arith.constant 0 : index
    %387 = vector.load %arg6[%c0_98, %c0_99] : memref<8x128xf32, #tpu.memory_space<vmem>>, vector<8x128xf32>
    tpu.vector_store %arg6[%c0_98, %c0_99], %386 {strides = array<i32>} : memref<8x128xf32, #tpu.memory_space<vmem>>, vector<8x128xf32>,
    return
  }
  func.func @transform_0(%arg0: i32) -> i32 {
    %c0_i32 = arith.constant 0 : i32
    %c0_i32_0 = arith.constant 0 : i32
    return %c0_i32 : i32
  }
  func.func @transform_1(%arg0: i32) -> i32 {
    %c0_i32 = arith.constant 0 : i32
    %c0_i32_0 = arith.constant 0 : i32
    return %c0_i32 : i32
  }
  func.func @transform_2(%arg0: i32) -> i32 {
    %c0_i32 = arith.constant 0 : i32
    %c0_i32_0 = arith.constant 0 : i32
    return %c0_i32 : i32
  }
  func.func @transform_3(%arg0: i32) -> i32 {
    %c0_i32 = arith.constant 0 : i32
    %c0_i32_0 = arith.constant 0 : i32
    return %c0_i32 : i32
  }
  func.func @transform_4(%arg0: i32) -> (i32, i32) {
    %c0_i32 = arith.constant 0 : i32
    %c0_i32_0 = arith.constant 0 : i32
    return %arg0, %c0_i32 : i32, i32
  }
  func.func @transform_5(%arg0: i32) -> (i32, i32) {
    %c0_i32 = arith.constant 0 : i32
    %c0_i32_0 = arith.constant 0 : i32
    return %arg0, %c0_i32 : i32, i32
  }
}

</mosaic_0001>

<bundles_post_ra>
// kernel: tpu_custom_call.1
= control target key start
LH: loop header
LB: loop body
LE: loop exit
PB: predicated region body
PF: predicated region fallthrough
CT: control target
= control target key end

     0   :  { %11 = vsyncpa [#allocation6], 0  ;;  %s943_s0 = inlined_call_operand.vmem [shape: f32[32], index: 0, kind: input, shape index: {}]   ;;  %s944_s1 = inlined_call_operand.vmem [shape: f32[32], index: 1, kind: input, shape index: {}]   ;;  %s945_s2 = inlined_call_operand.vmem [shape: f32[32], index: 2, kind: input, shape index: {}]   ;;  %s946_s3 = inlined_call_operand.<no memory space> [shape: f32[1], index: 3, kind: input, shape index: {}]   ;;  %s947_s4 = inlined_call_operand.hbm [shape: f32[8,128], index: 4, kind: input, shape index: {}]   ;;  %s948_s5 = inlined_call_operand.hbm [shape: f32[8,128], index: 5, kind: output, shape index: {}]  }
   0x1   :  { %12 = vsyncpa [#allocation8], 0 }
   0x2   :  { %13 = vsyncpa [#allocation4], 0  ;;  %s29_s20 = sshll.u32 %s944_s1, 4  ;;  %s30_s20 = int_to_ptr.vmem [resolvable:$true] %s29_s20 }
   0x3   :  { %14 = vsyncpa [#allocation5], 0  ;;  %s20_s23 = sshll.u32 %s943_s0, 4  ;;  %s637_s24 = smov [#allocation7]   ;;  %s21_s23 = int_to_ptr.vmem [resolvable:$true] %s20_s23 }
   0x4   :  { %32 = dma.vmem_to_smem %s30_s20, 16, %s637_s24, [#allocation8]  }
   0x5   :  { %s638_s25 = smov [#allocation3]   ;;  %s38_s28 = sshll.u32 %s945_s2, 4  ;;  %s39_s28 = int_to_ptr.vmem [resolvable:$true] %s38_s28 }
   0x6   :  { %23 = dma.vmem_to_smem %s21_s23, 16, %s638_s25, [#allocation6]  }
   0x7   :  { %s49_s1 = sshll.u32 %s947_s4, 4  ;;  %s639_s6 = smov [#allocation9]   ;;  %s50_s1 = int_to_ptr.hbm [resolvable:$true] %s49_s1 }
   0x8   :  { %41 = dma.vmem_to_smem %s39_s28, 16, %s639_s6, [#allocation8]  }
   0x9   :  { %s640_s7 = smov [#allocation10]  }
   0xa   :  { %s51_s8 = sshll.u32 %s640_s7, 4  ;;  %s52_s8 = int_to_ptr.vmem [resolvable:$true] %s51_s8 }
   0xb   :  { %54 = dma.hbm_to_vmem [thread:$0]  %s50_s1, 128, %s52_s8, [#allocation4]  }
   0xc   :  { %629 = dma.done.wait [#allocation6], 16  }
   0xd   :  { %630 = vsyncadd [#allocation6], 4294967280 }
   0xe   :  { %631 = dma.done.wait [#allocation8], 32  }
   0xf   :  { %632 = vsyncadd [#allocation8], 4294967264 }
  0x10   :  { %633 = dma.done.wait [#allocation4], 128  }
  0x11   :  { %634 = vsyncadd [#allocation4], 4294967168 }
  0x12   :  { %71 = sfence }
  0x13   :  { %s74_s0 = sld [smem:[#allocation3]]  ;;  %v714_v0 = vld [vmem:[#allocation10] sm:$0xff]  ;;  %v84_v27 = vstv %s946_s3 }
  0x14   :  { %s684_s2 = sld [smem:[#allocation7]] }
  0x15   :  { %s686_s9 = sld [smem:[#allocation9]] }
  0x16   :  { %s688_s4 = sld [smem:[#allocation3 + $0x1]] }
  0x17   :  { %s690_s10 = sld [smem:[#allocation7 + $0x1]] }
  0x18   :  { %s692_s11 = sld [smem:[#allocation9 + $0x1]] }
  0x19   :  { %s450_s12 = sld [smem:[#allocation3 + $0x2]]  ;;  %v75_v1 = vstv %s74_s0 }
  0x1a   :  { %s694_s13 = sld [smem:[#allocation7 + $0x2]]  ;;  %v76_v2 = vmul.f32 %v75_v1, %v714_v0  ;;  %v78_v3 = vstv %s684_s2 }
  0x1b   :  { %s696_s14 = sld [smem:[#allocation9 + $0x2]]  ;;  %v82_v17 = vstv %s686_s9 }
  0x1c   :  { %s453_s15 = sld [smem:[#allocation3 + $0x3]]  ;;  %v87_v4 = vstv %s688_s4  ;;  %v79_v7 = vadd.f32 %v78_v3, %v76_v2 }
  0x1d   :  { %s698_s16 = sld [smem:[#allocation7 + $0x3]]  ;;  %v88_v8 = vmul.f32 %v87_v4, %v714_v0  ;;  %v90_v11 = vstv %s690_s10 }
  0x1e   :  { %s700_s17 = sld [smem:[#allocation9 + $0x3]]  ;;  %v80_v16 = vmax.f32 %v79_v7, 0.0  ;;  %v94_v28 = vstv %s692_s11 }
  0x1f   :  { %s702_s18 = sld [smem:[#allocation3 + $0x4]]  ;;  %v97_v5 = vstv %s450_s12  ;;  %v91_v18 = vadd.f32 %v90_v11, %v88_v8 }
  0x20   :  { %s704_s19 = sld [smem:[#allocation7 + $0x4]]  ;;  %v98_v9 = vmul.f32 %v97_v5, %v714_v0  ;;  %v100_v12 = vstv %s694_s13  ;;  %v83_v26 = vmul.f32 %v82_v17, %v80_v16 }
  0x21   :  { %s706_s20 = sld [smem:[#allocation9 + $0x4]]  ;;  %v92_v30 = vmax.f32 %v91_v18, 0.0  ;;  %v104_v32 = vstv %s696_s14 }
  0x22   :  { %s708_s21 = sld [smem:[#allocation3 + $0x5]]  ;;  %v108_v6 = vstv %s453_s15  ;;  %v101_v19 = vadd.f32 %v100_v12, %v98_v9  ;;  %v85_v43 = vadd.f32 %v84_v27, %v83_v26 }
  0x23   :  { %s710_s22 = sld [smem:[#allocation7 + $0x5]]  ;;  %v109_v10 = vmul.f32 %v108_v6, %v714_v0  ;;  %v111_v13 = vstv %s698_s16  ;;  %v95_v44 = vmul.f32 %v94_v28, %v92_v30 }
  0x24   :  { %s712_s23 = sld [smem:[#allocation9 + $0x5]]  ;;  %v102_v31 = vmax.f32 %v101_v19, 0.0  ;;  %v115_v34 = vstv %s700_s17 }
  0x25   :  { %s716_s24 = sld [smem:[#allocation3 + $0x6]]  ;;  %v119_v14 = vstv %s702_s18  ;;  %v112_v20 = vadd.f32 %v111_v13, %v109_v10 }
  0x26   :  { %s718_s25 = sld [smem:[#allocation7 + $0x6]]  ;;  %v120_v21 = vmul.f32 %v119_v14, %v714_v0  ;;  %v122_v23 = vstv %s704_s19  ;;  %v105_v45 = vmul.f32 %v104_v32, %v102_v31 }
  0x27   :  { %s720_s26 = sld [smem:[#allocation9 + $0x6]]  ;;  %v113_v33 = vmax.f32 %v112_v20, 0.0  ;;  %v126_v48 = vstv %s706_s20 }
  0x28   :  { %s723_s27 = sld [smem:[#allocation3 + $0x7]]  ;;  %v130_v15 = vstv %s708_s21  ;;  %v123_v35 = vadd.f32 %v122_v23, %v120_v21  ;;  %v106_v58 = vadd.f32 %v105_v45, %v85_v43 }
  0x29   :  { %s726_s28 = sld [smem:[#allocation7 + $0x7]]  ;;  %v131_v22 = vmul.f32 %v130_v15, %v714_v0  ;;  %v133_v24 = vstv %s710_s22  ;;  %v116_v46 = vmul.f32 %v115_v34, %v113_v33 }
  0x2a   :  { %s729_s29 = sld [smem:[#allocation9 + $0x7]]  ;;  %v124_v47 = vmax.f32 %v123_v35, 0.0  ;;  %v137_v51 = vstv %s712_s23 }
  0x2b   :  { %s731_s30 = sld [smem:[#allocation3 + $0x8]]  ;;  %v141_v25 = vstv %s716_s24  ;;  %v134_v36 = vadd.f32 %v133_v24, %v131_v22  ;;  %v117_v59 = vadd.f32 %v116_v46, %v95_v44 }
  0x2c   :  { %s733_s1 = sld [smem:[#allocation7 + $0x8]]  ;;  %v142_v37 = vmul.f32 %v141_v25, %v714_v0  ;;  %v144_v38 = vstv %s718_s25  ;;  %v127_v61 = vmul.f32 %v126_v48, %v124_v47 }
  0x2d   :  { %s738_s6 = sld [smem:[#allocation9 + $0x8]]  ;;  %v135_v49 = vmax.f32 %v134_v36, 0.0  ;;  %v148_v1 = vstv %s720_s26 }
  0x2e   :  { %s743_s7 = sld [smem:[#allocation3 + $0x9]]  ;;  %v152_v29 = vstv %s723_s27  ;;  %v145_v50 = vadd.f32 %v144_v38, %v142_v37  ;;  %v128_v11 = vadd.f32 %v127_v61, %v106_v58 }
  0x2f   :  { %s747_s8 = sld [smem:[#allocation7 + $0x9]]  ;;  %v153_v39 = vmul.f32 %v152_v29, %v714_v0  ;;  %v155_v40 = vstv %s726_s28  ;;  %v138_v62 = vmul.f32 %v137_v51, %v135_v49 }
  0x30   :  { %s749_s0 = sld [smem:[#allocation9 + $0x9]]  ;;  %v146_v63 = vmax.f32 %v145_v50, 0.0  ;;  %v159_v6 = vstv %s729_s29 }
  0x31   :  { %s752_s2 = sld [smem:[#allocation3 + $0xa]]  ;;  %v163_v41 = vstv %s731_s30  ;;  %v156_v52 = vadd.f32 %v155_v40, %v153_v39  ;;  %v139_v12 = vadd.f32 %v138_v62, %v117_v59 }
  0x32   :  { %s756_s4 = sld [smem:[#allocation7 + $0xa]]  ;;  %v164_v53 = vmul.f32 %v163_v41, %v714_v0  ;;  %v166_v55 = vstv %s733_s1  ;;  %v149_v13 = vmul.f32 %v148_v1, %v146_v63 }
  0x33   :  { %s761_s10 = sld [smem:[#allocation9 + $0xa]]  ;;  %v157_v2 = vmax.f32 %v156_v52, 0.0  ;;  %v170_v19 = vstv %s738_s6 }
  0x34   :  { %s768_s13 = sld [smem:[#allocation3 + $0xb]]  ;;  %v174_v42 = vstv %s743_s7  ;;  %v167_v3 = vadd.f32 %v166_v55, %v164_v53  ;;  %v150_v26 = vadd.f32 %v149_v13, %v128_v11 }
  0x35   :  { %s771_s15 = sld [smem:[#allocation7 + $0xb]]  ;;  %v175_v54 = vmul.f32 %v174_v42, %v714_v0  ;;  %v177_v56 = vstv %s747_s8  ;;  %v160_v15 = vmul.f32 %v159_v6, %v157_v2 }
  0x36   :  { %s775_s3 = sld [smem:[#allocation9 + $0xb]]  ;;  %v168_v16 = vmax.f32 %v167_v3, 0.0  ;;  %v181_v20 = vstv %s749_s0 }
  0x37   :  { %s779_s11 = sld [smem:[#allocation3 + $0xc]]  ;;  %v185_v57 = vstv %s752_s2  ;;  %v178_v4 = vadd.f32 %v177_v56, %v175_v54  ;;  %v161_v29 = vadd.f32 %v160_v15, %v139_v12 }
  0x38   :  { %s784_s14 = sld [smem:[#allocation7 + $0xc]]  ;;  %v186_v5 = vmul.f32 %v185_v57, %v714_v0  ;;  %v188_v7 = vstv %s756_s4  ;;  %v171_v30 = vmul.f32 %v170_v19, %v168_v16 }
  0x39   :  { %s786_s16 = sld [smem:[#allocation9 + $0xc]]  ;;  %v179_v17 = vmax.f32 %v178_v4, 0.0  ;;  %v192_v33 = vstv %s761_s10 }
  0x3a   :  { %s789_s17 = sld [smem:[#allocation3 + $0xd]]  ;;  %v196_v60 = vstv %s768_s13  ;;  %v189_v18 = vadd.f32 %v188_v7, %v186_v5  ;;  %v172_v43 = vadd.f32 %v171_v30, %v150_v26 }
  0x3b   :  { %s794_s18 = sld [smem:[#allocation7 + $0xd]]  ;;  %v197_v8 = vmul.f32 %v196_v60, %v714_v0  ;;  %v199_v9 = vstv %s771_s15  ;;  %v182_v31 = vmul.f32 %v181_v20, %v179_v17 }
  0x3c   :  { %s799_s19 = sld [smem:[#allocation9 + $0xd]]  ;;  %v190_v32 = vmax.f32 %v189_v18, 0.0  ;;  %v203_v37 = vstv %s775_s3 }
  0x3d   :  { %s802_s20 = sld [smem:[#allocation3 + $0xe]]  ;;  %v207_v10 = vstv %s779_s11  ;;  %v200_v21 = vadd.f32 %v199_v9, %v197_v8  ;;  %v183_v44 = vadd.f32 %v182_v31, %v161_v29 }
  0x3e   :  { %s805_s21 = sld [smem:[#allocation7 + $0xe]]  ;;  %v208_v22 = vmul.f32 %v207_v10, %v714_v0  ;;  %v210_v23 = vstv %s784_s14  ;;  %v193_v45 = vmul.f32 %v192_v33, %v190_v32 }
  0x3f   :  { %s808_s22 = sld [smem:[#allocation9 + $0xe]]  ;;  %v201_v34 = vmax.f32 %v200_v21, 0.0  ;;  %v214_v50 = vstv %s786_s16 }
  0x40   :  { %s813_s23 = sld [smem:[#allocation3 + $0xf]]  ;;  %v218_v14 = vstv %s789_s17  ;;  %v211_v35 = vadd.f32 %v210_v23, %v208_v22  ;;  %v194_v59 = vadd.f32 %v193_v45, %v172_v43 }
  0x41   :  { %s817_s24 = sld [smem:[#allocation7 + $0xf]]  ;;  %v219_v24 = vmul.f32 %v218_v14, %v714_v0  ;;  %v221_v27 = vstv %s794_s18  ;;  %v204_v46 = vmul.f32 %v203_v37, %v201_v34 }
  0x42   :  { %s820_s25 = sld [smem:[#allocation9 + $0xf]]  ;;  %v212_v47 = vmax.f32 %v211_v35, 0.0  ;;  %v225_v54 = vstv %s799_s19 }
  0x43   :  { %s822_s26 = sld [smem:[#allocation3 + $0x10]]  ;;  %v229_v25 = vstv %s802_s20  ;;  %v222_v38 = vadd.f32 %v221_v27, %v219_v24  ;;  %v205_v60 = vadd.f32 %v204_v46, %v183_v44 }
  0x44   :  { %s827_s27 = sld [smem:[#allocation7 + $0x10]]  ;;  %v230_v36 = vmul.f32 %v229_v25, %v714_v0  ;;  %v232_v39 = vstv %s805_s21  ;;  %v215_v61 = vmul.f32 %v214_v50, %v212_v47 }
  0x45   :  { %s832_s28 = sld [smem:[#allocation9 + $0x10]]  ;;  %v223_v51 = vmax.f32 %v222_v38, 0.0  ;;  %v236_v1 = vstv %s808_s22 }
  0x46   :  { %v240_v28 = vstv %s813_s23  ;;  %s836_s29 = sld [smem:[#allocation3 + $0x11]]  ;;  %v233_v48 = vadd.f32 %v232_v39, %v230_v36  ;;  %v216_v11 = vadd.f32 %v215_v61, %v194_v59 }
  0x47   :  { %s838_s30 = sld [smem:[#allocation7 + $0x11]]  ;;  %v241_v40 = vmul.f32 %v240_v28, %v714_v0  ;;  %v243_v41 = vstv %s817_s24  ;;  %v226_v63 = vmul.f32 %v225_v54, %v223_v51 }
  0x48   :  { %s842_s1 = sld [smem:[#allocation9 + $0x11]]  ;;  %v234_v62 = vmax.f32 %v233_v48, 0.0  ;;  %v247_v4 = vstv %s820_s25 }
  0x49   :  { %s847_s6 = sld [smem:[#allocation3 + $0x12]]  ;;  %v251_v42 = vstv %s822_s26  ;;  %v244_v52 = vadd.f32 %v243_v41, %v241_v40  ;;  %v227_v13 = vadd.f32 %v226_v63, %v205_v60 }
  0x4a   :  { %s851_s7 = sld [smem:[#allocation7 + $0x12]]  ;;  %v252_v53 = vmul.f32 %v251_v42, %v714_v0  ;;  %v254_v55 = vstv %s827_s27  ;;  %v237_v12 = vmul.f32 %v236_v1, %v234_v62 }
  0x4b   :  { %s853_s8 = sld [smem:[#allocation9 + $0x12]]  ;;  %v245_v2 = vmax.f32 %v244_v52, 0.0  ;;  %v258_v17 = vstv %s832_s28 }
  0x4c   :  { %v262_v49 = vstv %s836_s29  ;;  %s501_s0 = sld [smem:[#allocation3 + $0x13]]  ;;  %v255_v3 = vadd.f32 %v254_v55, %v252_v53  ;;  %v238_v23 = vadd.f32 %v237_v12, %v216_v11 }
  0x4d   :  { %s858_s2 = sld [smem:[#allocation7 + $0x13]]  ;;  %v263_v56 = vmul.f32 %v262_v49, %v714_v0  ;;  %v265_v57 = vstv %s838_s30  ;;  %v248_v14 = vmul.f32 %v247_v4, %v245_v2 }
  0x4e   :  { %s863_s4 = sld [smem:[#allocation9 + $0x13]]  ;;  %v256_v15 = vmax.f32 %v255_v3, 0.0  ;;  %v269_v21 = vstv %s842_s1 }
  0x4f   :  { %v273_v58 = vstv %s847_s6  ;;  %s867_s10 = sld [smem:[#allocation3 + $0x14]]  ;;  %v266_v5 = vadd.f32 %v265_v57, %v263_v56  ;;  %v249_v26 = vadd.f32 %v248_v14, %v227_v13 }
  0x50   :  { %s869_s9 = sld [smem:[#allocation7 + $0x14]]  ;;  %v274_v6 = vmul.f32 %v273_v58, %v714_v0  ;;  %v276_v8 = vstv %s851_s7  ;;  %v259_v27 = vmul.f32 %v258_v17, %v256_v15 }
  0x51   :  { %s872_s12 = sld [smem:[#allocation9 + $0x14]]  ;;  %v267_v18 = vmax.f32 %v266_v5, 0.0  ;;  %v280_v32 = vstv %s853_s8 }
  0x52   :  { %v284_v7 = vstv %s501_s0  ;;  %s507_s13 = sld [smem:[#allocation3 + $0x15]]  ;;  %v277_v19 = vadd.f32 %v276_v8, %v274_v6  ;;  %v260_v39 = vadd.f32 %v259_v27, %v238_v23 }
  0x53   :  { %v285_v9 = vmul.f32 %v284_v7, %v714_v0  ;;  %v287_v10 = vstv %s858_s2  ;;  %s879_s15 = sld [smem:[#allocation7 + $0x15]]  ;;  %v270_v30 = vmul.f32 %v269_v21, %v267_v18 }
  0x54   :  { %s881_s3 = sld [smem:[#allocation9 + $0x15]]  ;;  %v278_v31 = vmax.f32 %v277_v19, 0.0  ;;  %v291_v34 = vstv %s863_s4 }
  0x55   :  { %v295_v16 = vstv %s867_s10  ;;  %s510_s11 = sld [smem:[#allocation3 + $0x16]]  ;;  %v288_v20 = vadd.f32 %v287_v10, %v285_v9  ;;  %v271_v41 = vadd.f32 %v270_v30, %v249_v26 }
  0x56   :  { %s885_s14 = sld [smem:[#allocation7 + $0x16]]  ;;  %v296_v22 = vmul.f32 %v295_v16, %v714_v0  ;;  %v298_v24 = vstv %s869_s9  ;;  %v281_v42 = vmul.f32 %v280_v32, %v278_v31 }
  0x57   :  { %s889_s16 = sld [smem:[#allocation9 + $0x16]]  ;;  %v289_v33 = vmax.f32 %v288_v20, 0.0  ;;  %v302_v49 = vstv %s872_s12 }
  0x58   :  { %v306_v25 = vstv %s507_s13  ;;  %s513_s17 = sld [smem:[#allocation3 + $0x17]]  ;;  %v299_v35 = vadd.f32 %v298_v24, %v296_v22  ;;  %v282_v56 = vadd.f32 %v281_v42, %v260_v39 }
  0x59   :  { %v307_v28 = vmul.f32 %v306_v25, %v714_v0  ;;  %v309_v29 = vstv %s879_s15  ;;  %s514_s18 = sld [smem:[#allocation7 + $0x17]]  ;;  %v292_v43 = vmul.f32 %v291_v34, %v289_v33 }
  0x5a   :  { %s895_s19 = sld [smem:[#allocation9 + $0x17]]  ;;  %v300_v45 = vmax.f32 %v299_v35, 0.0  ;;  %v313_v50 = vstv %s881_s3 }
  0x5b   :  { %v310_v36 = vadd.f32 %v309_v29, %v307_v28  ;;  %v317_v37 = vstv %s510_s11  ;;  %s516_s20 = sld [smem:[#allocation3 + $0x18]]  ;;  %v293_v57 = vadd.f32 %v292_v43, %v271_v41  ;;  %s641_s11 = smov [#allocation11]  }
  0x5c   :  { %v318_v38 = vmul.f32 %v317_v37, %v714_v0  ;;  %s899_s21 = sld [smem:[#allocation7 + $0x18]]  ;;  %v320_v40 = vstv %s885_s14  ;;  %v303_v58 = vmul.f32 %v302_v49, %v300_v45  ;;  %s433_s14 = sshll.u32 %s641_s11, 4  ;;  %s434_s14 = int_to_ptr.vmem [resolvable:$true] %s433_s14 }
  0x5d   :  { %s902_s22 = sld [smem:[#allocation9 + $0x18]]  ;;  %v311_v46 = vmax.f32 %v310_v36, 0.0  ;;  %v324_v61 = vstv %s889_s16 }
  0x5e   :  { %v328_v44 = vstv %s513_s17  ;;  %s519_s23 = sld [smem:[#allocation3 + $0x19]]  ;;  %v321_v51 = vadd.f32 %v320_v40, %v318_v38  ;;  %v304_v5 = vadd.f32 %v303_v58, %v282_v56 }
  0x5f   :  { %v329_v47 = vmul.f32 %v328_v44, %v714_v0  ;;  %v331_v48 = vstv %s514_s18  ;;  %s520_s24 = sld [smem:[#allocation7 + $0x19]]  ;;  %v314_v59 = vmul.f32 %v313_v50, %v311_v46  ;;  %s435_s18 = sshll.u32 %s948_s5, 4  ;;  %s436_s18 = int_to_ptr.hbm [resolvable:$true] %s435_s18 }
  0x60   :  { %s907_s25 = sld [smem:[#allocation9 + $0x19]]  ;;  %v322_v60 = vmax.f32 %v321_v51, 0.0  ;;  %v335_v1 = vstv %s895_s19 }
  0x61   :  { %v332_v52 = vadd.f32 %v331_v48, %v329_v47  ;;  %v339_v53 = vstv %s516_s20  ;;  %s522_s26 = sld [smem:[#allocation3 + $0x1a]]  ;;  %v315_v6 = vadd.f32 %v314_v59, %v293_v57 }
  0x62   :  { %v340_v54 = vmul.f32 %v339_v53, %v714_v0  ;;  %v342_v55 = vstv %s899_s21  ;;  %s911_s27 = sld [smem:[#allocation7 + $0x1a]]  ;;  %v325_v9 = vmul.f32 %v324_v61, %v322_v60 }
  0x63   :  { %s913_s28 = sld [smem:[#allocation9 + $0x1a]]  ;;  %v333_v62 = vmax.f32 %v332_v52, 0.0  ;;  %v346_v14 = vstv %s902_s22 }
  0x64   :  { %v350_v63 = vstv %s519_s23  ;;  %s525_s29 = sld [smem:[#allocation3 + $0x1b]]  ;;  %v343_v2 = vadd.f32 %v342_v55, %v340_v54  ;;  %v326_v21 = vadd.f32 %v325_v9, %v304_v5 }
  0x65   :  { %v351_v3 = vmul.f32 %v350_v63, %v714_v0  ;;  %v353_v4 = vstv %s520_s24  ;;  %s526_s30 = sld [smem:[#allocation7 + $0x1b]]  ;;  %v336_v10 = vmul.f32 %v335_v1, %v333_v62 }
  0x66   :  { %s918_s1 = sld [smem:[#allocation9 + $0x1b]]  ;;  %v344_v13 = vmax.f32 %v343_v2, 0.0  ;;  %v357_v18 = vstv %s907_s25 }
  0x67   :  { %v354_v7 = vadd.f32 %v353_v4, %v351_v3  ;;  %v361_v8 = vstv %s522_s26  ;;  %s528_s6 = sld [smem:[#allocation3 + $0x1c]]  ;;  %v337_v22 = vadd.f32 %v336_v10, %v315_v6 }
  0x68   :  { %v362_v11 = vmul.f32 %v361_v8, %v714_v0  ;;  %v364_v12 = vstv %s911_s27  ;;  %s529_s7 = sld [smem:[#allocation7 + $0x1c]]  ;;  %v347_v23 = vmul.f32 %v346_v14, %v344_v13 }
  0x69   :  { %s922_s8 = sld [smem:[#allocation9 + $0x1c]]  ;;  %v355_v15 = vmax.f32 %v354_v7, 0.0  ;;  %v368_v28 = vstv %s913_s28 }
  0x6a   :  { %v365_v16 = vadd.f32 %v364_v12, %v362_v11  ;;  %v372_v17 = vstv %s525_s29  ;;  %s531_s0 = sld [smem:[#allocation3 + $0x1d]]  ;;  %v348_v35 = vadd.f32 %v347_v23, %v326_v21 }
  0x6b   :  { %v373_v19 = vmul.f32 %v372_v17, %v714_v0  ;;  %v375_v20 = vstv %s526_s30  ;;  %s532_s2 = sld [smem:[#allocation7 + $0x1d]]  ;;  %v358_v27 = vmul.f32 %v357_v18, %v355_v15 }
  0x6c   :  { %s927_s4 = sld [smem:[#allocation9 + $0x1d]]  ;;  %v366_v24 = vmax.f32 %v365_v16, 0.0  ;;  %v379_v32 = vstv %s918_s1 }
  0x6d   :  { %v376_v25 = vadd.f32 %v375_v20, %v373_v19  ;;  %v383_v26 = vstv %s528_s6  ;;  %s534_s10 = sld [smem:[#allocation3 + $0x1e]]  ;;  %v359_v39 = vadd.f32 %v358_v27, %v337_v22 }
  0x6e   :  { %v384_v29 = vmul.f32 %v383_v26, %v714_v0  ;;  %v386_v30 = vstv %s529_s7  ;;  %s535_s9 = sld [smem:[#allocation7 + $0x1e]]  ;;  %v369_v36 = vmul.f32 %v368_v28, %v366_v24 }
  0x6f   :  { %v377_v31 = vmax.f32 %v376_v25, 0.0  ;;  %s932_s12 = sld [smem:[#allocation9 + $0x1e]]  ;;  %v390_v42 = vstv %s922_s8 }
  0x70   :  { %v387_v33 = vadd.f32 %v386_v30, %v384_v29  ;;  %v394_v34 = vstv %s531_s0  ;;  %s537_s13 = sld [smem:[#allocation3 + $0x1f]]  ;;  %v370_v48 = vadd.f32 %v369_v36, %v348_v35 }
  0x71   :  { %v395_v37 = vmul.f32 %v394_v34, %v714_v0  ;;  %v397_v38 = vstv %s532_s2  ;;  %s538_s15 = sld [smem:[#allocation7 + $0x1f]]  ;;  %v380_v40 = vmul.f32 %v379_v32, %v377_v31 }
  0x72   :  { %v388_v41 = vmax.f32 %v387_v33, 0.0  ;;  %s539_s3 = sld [smem:[#allocation9 + $0x1f]]  ;;  %v401_v45 = vstv %s927_s4 }
  0x73   :  { %v398_v43 = vadd.f32 %v397_v38, %v395_v37  ;;  %v405_v44 = vstv %s534_s10  ;;  %v381_v51 = vadd.f32 %v380_v40, %v359_v39 }
  0x74   :  { %v406_v46 = vmul.f32 %v405_v44, %v714_v0  ;;  %v408_v47 = vstv %s535_s9  ;;  %v391_v49 = vmul.f32 %v390_v42, %v388_v41 }
  0x75   :  { %v399_v50 = vmax.f32 %v398_v43, 0.0  ;;  %v412_v55 = vstv %s932_s12 }
  0x76   :  { %v409_v52 = vadd.f32 %v408_v47, %v406_v46  ;;  %v416_v53 = vstv %s537_s13  ;;  %v392_v59 = vadd.f32 %v391_v49, %v370_v48 }
  0x77   :  { %v402_v54 = vmul.f32 %v401_v45, %v399_v50  ;;  %v417_v56 = vmul.f32 %v416_v53, %v714_v0  ;;  %v419_v57 = vstv %s538_s15 }
  0x78   :  { %v410_v58 = vmax.f32 %v409_v52, 0.0  ;;  %v423_v62 = vstv %s539_s3 }
  0x79   :  { %v420_v60 = vadd.f32 %v419_v57, %v417_v56  ;;  %v403_v63 = vadd.f32 %v402_v54, %v381_v51 }
  0x7a   :  { %v413_v61 = vmul.f32 %v412_v55, %v410_v58 }
  0x7b   :  { %v421_v1 = vmax.f32 %v420_v60, 0.0 }
  0x7c   :  { %v414_v2 = vadd.f32 %v413_v61, %v392_v59 }
  0x7d   :  { %v424_v3 = vmul.f32 %v423_v62, %v421_v1 }
  0x7f   :  { %v425_v4 = vadd.f32 %v424_v3, %v403_v63 }
  0x81   :  { %v426_v5 = vadd.f32 %v425_v4, %v414_v2 }
  0x83   :  { %427 = vst [vmem:[#allocation11] sm:$0xff] %v426_v5 }
  0x84   :  { %438 = dma.vmem_to_hbm [thread:$0]  %s434_s14, 128, %s436_s18, [#allocation5]  }
  0x85   :  { %635 = dma.done.wait [#allocation5], 128  }
  0x86   :  { %636 = vsyncadd [#allocation5], 4294967168 }
  0x87   :  { %443 = vsyncpa [#allocation4], 1 }
  0x88   :  { %444 = vsyncpa [#allocation5], 1 }
  0x89   :  { %445 = vsyncpa [#allocation6], 1 }
  0x8a   :  { %446 = vsyncpa [#allocation8], 1 }

</bundles_post_ra>
